<compile_context>
chip_gen: v7x
topology: tpu7x:2x2x1
jax: 0.10.0
libtpu: 0.0.40
codegen_flags: <defaults>
</compile_context>

<pallas_src>
import jax
import jax.numpy as jnp
from jax.experimental import pallas as pl
from jax.experimental.pallas import tpu as pltpu


def _round_up(v, m):
    return -(-v // m) * m


# ----------------------------------------------------------------------------
# Kernel: one (tm, d_in) tile of tokens through fc1 -> SiLU -> fc2, with the
# hidden dim as the (last, "arbitrary") reduction grid axis.
# ----------------------------------------------------------------------------
def _mlp_kernel(x_ref, w1_ref, b1_ref, w2_ref, b2_ref, o_ref, acc_ref):
    k = pl.program_id(1)

    @pl.when(k == 0)
    def _():
        acc_ref[...] = jnp.zeros_like(acc_ref)

    # fc1 slab: (tm, d_in) @ (d_in, t_hid) on the MXU, f32 accumulation.
    h = jnp.dot(x_ref[...], w1_ref[...], preferred_element_type=jnp.float32)
    h = h + b1_ref[...]                       # f32 bias add (VPU)
    h = h * jax.nn.sigmoid(h)                 # SiLU in f32 (EUP sigmoid + VPU mul)

    # fc2 partial product: (tm, t_hid) @ (t_hid, d_out), accumulate in f32 VMEM.
    acc_ref[...] += jnp.dot(h.astype(w2_ref.dtype), w2_ref[...],
                            preferred_element_type=jnp.float32)

    @pl.when(k == pl.num_programs(1) - 1)
    def _():
        o_ref[...] = (acc_ref[...] + b2_ref[...]).astype(o_ref.dtype)


# ----------------------------------------------------------------------------
# One-time (load-time) weight preparation: transpose PyTorch (out, in) layout
# to (in, out), cast to bf16, zero-pad the hidden dim to a multiple of the
# hidden tile so the in-kernel reduction never mixes in garbage columns.
# Do NOT call this per forward pass.
# ----------------------------------------------------------------------------
def prepare_mlp_params(params, *, compute_dtype=jnp.bfloat16, hid_tile=512):
    w1 = jnp.transpose(params["w1"], (1, 0))          # (d_in, d_hid)
    w2 = jnp.transpose(params["w2"], (1, 0))          # (d_hid, d_out)
    b1 = params["b1"].reshape(1, -1)                  # (1, d_hid)
    b2 = params["b2"].reshape(1, -1)                  # (1, d_out)
    d_in, d_hid = w1.shape
    d_out = w2.shape[1]

    if d_hid <= hid_tile:
        t_hid = d_hid                                  # single reduction step
        d_hid_p = d_hid
    else:
        t_hid = hid_tile                               # 256-aligned (v6e/v7x MXU)
        d_hid_p = _round_up(d_hid, hid_tile)

    if d_hid_p != d_hid:
        # zero-padded hidden cols: SiLU(0 + 0) = 0 -> contributes nothing.
        w1 = jnp.pad(w1, ((0, 0), (0, d_hid_p - d_hid)))
        b1 = jnp.pad(b1, ((0, 0), (0, d_hid_p - d_hid)))
        w2 = jnp.pad(w2, ((0, d_hid_p - d_hid), (0, 0)))

    return dict(
        w1=w1.astype(compute_dtype),
        b1=b1.astype(jnp.float32),     # biases stay f32 (tiny; added to f32 acc)
        w2=w2.astype(compute_dtype),
        b2=b2.astype(jnp.float32),
        t_hid=t_hid, d_in=d_in, d_hid=d_hid_p, d_out=d_out,
        compute_dtype=compute_dtype,
    )


# ----------------------------------------------------------------------------
# Wrapper: flatten tokens, tile M, pallas_call, reshape back.
# ----------------------------------------------------------------------------
def mlp_pallas(x, prep, *, tile_m=512, out_dtype=jnp.bfloat16):
    lead = x.shape[:-1]
    d_in = x.shape[-1]
    assert d_in == prep["d_in"], (d_in, prep["d_in"])
    m = 1
    for s in lead:
        m *= s

    cdt = prep["compute_dtype"]
    x2 = x.reshape(m, d_in)
    if x2.dtype != cdt:
        x2 = x2.astype(cdt)            # ideally the caller already passes bf16

    d_hid, d_out, t_hid = prep["d_hid"], prep["d_out"], prep["t_hid"]

    # Row tile: 16-aligned (bf16 sublane packing).  Cap so the "parallel" M
    # axis has >= 2 tiles when there is enough work (v7x has 2 TensorCores).
    tm = min(tile_m, _round_up(m, 16))
    if m >= 256:
        tm = min(tm, _round_up(-(-m // 2), 16))
    m_tiles = -(-m // tm)              # boundary tile handled by Pallas masking
    hid_tiles = d_hid // t_hid
    grid = (m_tiles, hid_tiles)

    # Explicit VMEM limit sized to the tiles (default scoped limit is only
    # 16/32 MiB, far below physical, and would otherwise constrain tiling).
    isz = jnp.dtype(cdt).itemsize
    vmem_need = (
        2 * (tm * d_in + d_in * t_hid + t_hid * d_out) * isz   # dbl-buf inputs
        + 2 * (t_hid + d_out) * 4                              # biases (f32)
        + 2 * tm * d_out * jnp.dtype(out_dtype).itemsize       # dbl-buf output
        + tm * d_out * 4                                       # f32 accumulator
        + 2 * tm * t_hid * 4                                   # f32 h temporaries
    )
    vmem_limit = min(max(int(vmem_need * 1.5) + (4 << 20), 32 << 20), 64 << 20)

    out = pl.pallas_call(
        _mlp_kernel,
        out_shape=jax.ShapeDtypeStruct((m, d_out), out_dtype),
        grid_spec=pltpu.PrefetchScalarGridSpec(
            num_scalar_prefetch=0,
            grid=grid,
            in_specs=[
                pl.BlockSpec((tm, d_in), lambda i, k: (i, 0)),     # x tile
                pl.BlockSpec((d_in, t_hid), lambda i, k: (0, k)),  # w1 col-tile
                pl.BlockSpec((1, t_hid), lambda i, k: (0, k)),     # b1 tile
                pl.BlockSpec((t_hid, d_out), lambda i, k: (k, 0)), # w2 row-tile
                pl.BlockSpec((1, d_out), lambda i, k: (0, 0)),     # b2
            ],
            out_specs=pl.BlockSpec((tm, d_out), lambda i, k: (i, 0)),
            scratch_shapes=[pltpu.VMEM((tm, d_out), jnp.float32)],
        ),
        compiler_params=pltpu.CompilerParams(
            dimension_semantics=("parallel", "arbitrary"),
            vmem_limit_bytes=vmem_limit,
        ),
    )(x2, prep["w1"], prep["b1"], prep["w2"], prep["b2"])

    return out.reshape(*lead, d_out)


# ----------------------------------------------------------------------------
# Pure-JAX reference mirroring the PyTorch forward (drop = 0.0 -> identity)
# ----------------------------------------------------------------------------
def mlp_ref(x, params):
    h = x @ params["w1"].T + params["b1"]
    h = h * jax.nn.sigmoid(h)          # SiLU
    return h @ params["w2"].T + params["b2"]


# ----------------------------------------------------------------------------
if __name__ == "__main__":
    # Small shapes consistent with the module: batch=2, seq=8,
    # in_features=32, hidden_features=64, out_features=32.
    B, N, D_IN, D_HID, D_OUT = 2, 8, 32, 64, 32

    key = jax.random.PRNGKey(0)
    k1, k2, k3, k4, kx = jax.random.split(key, 5)
    params = dict(
        w1=0.1 * jax.random.normal(k1, (D_HID, D_IN), jnp.float32),
        b1=0.1 * jax.random.normal(k2, (D_HID,), jnp.float32),
        w2=0.1 * jax.random.normal(k3, (D_OUT, D_HID), jnp.float32),
        b2=0.1 * jax.random.normal(k4, (D_OUT,), jnp.float32),
    )
    # Keep activations in bf16 end-to-end (MXU-native on all gens).
    x = jax.random.normal(kx, (B, N, D_IN), jnp.float32).astype(jnp.bfloat16)

    prep = prepare_mlp_params(params)          # one-time, off the hot path
    out = jax.block_until_ready(mlp_pallas(x, prep))
    assert out.shape == (B, N, D_OUT), out.shape
    assert out.dtype == jnp.bfloat16, out.dtype

    ref = jax.block_until_ready(mlp_ref(x.astype(jnp.float32), params))
    err = float(jnp.max(jnp.abs(out.astype(jnp.float32) - ref)))
    assert err < 3e-2, f"max abs err {err}"

    print("KERNEL_OK")
</pallas_src>

<mosaic_0001>
module attributes {stable_mosaic.version = 11 : i64} {
  func.func @_mlp_kernel(%arg0: i32, %arg1: i32, %arg2: memref<16x32xbf16, #tpu.memory_space<vmem>>, %arg3: memref<32x64xbf16, #tpu.memory_space<vmem>>, %arg4: memref<1x64xf32, #tpu.memory_space<vmem>>, %arg5: memref<64x32xbf16, #tpu.memory_space<vmem>>, %arg6: memref<1x32xf32, #tpu.memory_space<vmem>>, %arg7: memref<16x32xbf16, #tpu.memory_space<vmem>>, %arg8: memref<16x32xf32, #tpu.memory_space<vmem>>) attributes {dimension_semantics = [#tpu.dimension_semantics<parallel>, #tpu.dimension_semantics<arbitrary>], iteration_bounds = array<i64: 1, 1>, scalar_prefetch = 0 : i64, scratch_operands = 1 : i64, tpu.core_type = #tpu.core_type<tc>, window_params = [{transform_indices = @transform_0, window_bounds = array<i64: 16, 32>}, {transform_indices = @transform_1, window_bounds = array<i64: 32, 64>}, {transform_indices = @transform_2, window_bounds = array<i64: 1, 64>}, {transform_indices = @transform_3, window_bounds = array<i64: 64, 32>}, {pipeline_mode = #tpu.pipeline_mode<synchronous>, transform_indices = @transform_4, window_bounds = array<i64: 1, 32>}, {transform_indices = @transform_5, window_bounds = array<i64: 16, 32>}]} {
    %c0_i32 = arith.constant 0 : i32
    %0 = arith.cmpi eq, %arg1, %c0_i32 : i32
    %1 = arith.extui %0 : i1 to i32
    %c0_i32_0 = arith.constant 0 : i32
    %2 = arith.cmpi ne, %1, %c0_i32_0 : i32
    scf.if %2 {
      %cst_16 = arith.constant 0.000000e+00 : f32
      %24 = vector.broadcast %cst_16 : f32 to vector<16x32xf32>
      %c0_17 = arith.constant 0 : index
      %c0_18 = arith.constant 0 : index
      %25 = vector.load %arg8[%c0_17, %c0_18] : memref<16x32xf32, #tpu.memory_space<vmem>>, vector<16x32xf32>
      tpu.vector_store %arg8[%c0_17, %c0_18], %24 {strides = array<i32>} : memref<16x32xf32, #tpu.memory_space<vmem>>, vector<16x32xf32>,
    } else {
    }
    %c0 = arith.constant 0 : index
    %c0_1 = arith.constant 0 : index
    %3 = vector.load %arg2[%c0, %c0_1] : memref<16x32xbf16, #tpu.memory_space<vmem>>, vector<16x32xbf16>
    %c0_2 = arith.constant 0 : index
    %c0_3 = arith.constant 0 : index
    %4 = vector.load %arg3[%c0_2, %c0_3] : memref<32x64xbf16, #tpu.memory_space<vmem>>, vector<32x64xbf16>
    %cst = arith.constant dense<0.000000e+00> : vector<16x64xf32>
    %5 = tpu.matmul %3, %4, %cst {dimension_numbers = #tpu.dot_dimension_numbers<[1], [0], [0], [1], [0, 0, 1, 1], [], []>} : vector<16x32xbf16>, vector<32x64xbf16>, vector<16x64xf32> -> vector<16x64xf32>
    %c0_4 = arith.constant 0 : index
    %c0_5 = arith.constant 0 : index
    %6 = vector.load %arg4[%c0_4, %c0_5] : memref<1x64xf32, #tpu.memory_space<vmem>>, vector<1x64xf32>
    %7 = vector.broadcast %6 : vector<1x64xf32> to vector<16x64xf32>
    %8 = arith.addf %5, %7 : vector<16x64xf32>
    %9 = arith.negf %8 : vector<16x64xf32>
    %10 = math.exp %9 : vector<16x64xf32>
    %cst_6 = arith.constant 1.000000e+00 : f32
    %11 = vector.broadcast %cst_6 : f32 to vector<16x64xf32>
    %12 = arith.addf %11, %10 : vector<16x64xf32>
    %13 = arith.divf %11, %12 : vector<16x64xf32>
    %14 = arith.mulf %8, %13 : vector<16x64xf32>
    %c0_7 = arith.constant 0 : index
    %c0_8 = arith.constant 0 : index
    %15 = vector.load %arg8[%c0_7, %c0_8] : memref<16x32xf32, #tpu.memory_space<vmem>>, vector<16x32xf32>
    %16 = arith.truncf %14 : vector<16x64xf32> to vector<16x64xbf16>
    %c0_9 = arith.constant 0 : index
    %c0_10 = arith.constant 0 : index
    %17 = vector.load %arg5[%c0_9, %c0_10] : memref<64x32xbf16, #tpu.memory_space<vmem>>, vector<64x32xbf16>
    %cst_11 = arith.constant dense<0.000000e+00> : vector<16x32xf32>
    %18 = tpu.matmul %16, %17, %cst_11 {dimension_numbers = #tpu.dot_dimension_numbers<[1], [0], [0], [1], [0, 0, 1, 1], [], []>} : vector<16x64xbf16>, vector<64x32xbf16>, vector<16x32xf32> -> vector<16x32xf32>
    %19 = arith.addf %15, %18 : vector<16x32xf32>
    %c0_12 = arith.constant 0 : index
    %c0_13 = arith.constant 0 : index
    %20 = vector.load %arg8[%c0_12, %c0_13] : memref<16x32xf32, #tpu.memory_space<vmem>>, vector<16x32xf32>
    tpu.vector_store %arg8[%c0_12, %c0_13], %19 {strides = array<i32>} : memref<16x32xf32, #tpu.memory_space<vmem>>, vector<16x32xf32>,
    %c0_i32_14 = arith.constant 0 : i32
    %21 = arith.cmpi eq, %arg1, %c0_i32_14 : i32
    %22 = arith.extui %21 : i1 to i32
    %c0_i32_15 = arith.constant 0 : i32
    %23 = arith.cmpi ne, %22, %c0_i32_15 : i32
    scf.if %23 {
      %c0_16 = arith.constant 0 : index
      %c0_17 = arith.constant 0 : index
      %24 = vector.load %arg8[%c0_16, %c0_17] : memref<16x32xf32, #tpu.memory_space<vmem>>, vector<16x32xf32>
      %c0_18 = arith.constant 0 : index
      %c0_19 = arith.constant 0 : index
      %25 = vector.load %arg6[%c0_18, %c0_19] : memref<1x32xf32, #tpu.memory_space<vmem>>, vector<1x32xf32>
      %26 = vector.broadcast %25 : vector<1x32xf32> to vector<16x32xf32>
      %27 = arith.addf %24, %26 : vector<16x32xf32>
      %28 = arith.truncf %27 : vector<16x32xf32> to vector<16x32xbf16>
      %c0_20 = arith.constant 0 : index
      %c0_21 = arith.constant 0 : index
      %29 = vector.load %arg7[%c0_20, %c0_21] : memref<16x32xbf16, #tpu.memory_space<vmem>>, vector<16x32xbf16>
      tpu.vector_store %arg7[%c0_20, %c0_21], %28 {strides = array<i32>} : memref<16x32xbf16, #tpu.memory_space<vmem>>, vector<16x32xbf16>,
    } else {
    }
    return
  }
  func.func @transform_0(%arg0: i32, %arg1: i32) -> (i32, i32) {
    %c0_i32 = arith.constant 0 : i32
    %c0_i32_0 = arith.constant 0 : i32
    return %arg0, %c0_i32 : i32, i32
  }
  func.func @transform_1(%arg0: i32, %arg1: i32) -> (i32, i32) {
    %c0_i32 = arith.constant 0 : i32
    %c0_i32_0 = arith.constant 0 : i32
    return %c0_i32, %arg1 : i32, i32
  }
  func.func @transform_2(%arg0: i32, %arg1: i32) -> (i32, i32) {
    %c0_i32 = arith.constant 0 : i32
    %c0_i32_0 = arith.constant 0 : i32
    return %c0_i32, %arg1 : i32, i32
  }
  func.func @transform_3(%arg0: i32, %arg1: i32) -> (i32, i32) {
    %c0_i32 = arith.constant 0 : i32
    %c0_i32_0 = arith.constant 0 : i32
    return %arg1, %c0_i32 : i32, i32
  }
  func.func @transform_4(%arg0: i32, %arg1: i32) -> (i32, i32) {
    %c0_i32 = arith.constant 0 : i32
    %c0_i32_0 = arith.constant 0 : i32
    %c0_i32_1 = arith.constant 0 : i32
    return %c0_i32, %c0_i32_0 : i32, i32
  }
  func.func @transform_5(%arg0: i32, %arg1: i32) -> (i32, i32) {
    %c0_i32 = arith.constant 0 : i32
    %c0_i32_0 = arith.constant 0 : i32
    return %arg0, %c0_i32 : i32, i32
  }
}

</mosaic_0001>

<bundles_post_ra>
// kernel: tpu_custom_call.1
= control target key start
LH: loop header
LB: loop body
LE: loop exit
PB: predicated region body
PF: predicated region fallthrough
CT: control target
= control target key end

     0   :  { %v332_v1 = vmov 0.0   ;;  %vm333_vm0 = vmmov 0   ;;  %vm26_vm1 = vcmask 261120   ;;  %s411_s0 = inlined_call_operand.vmem [shape: bf16[16,32], index: 0, kind: input, shape index: {}]   ;;  %s412_s1 = inlined_call_operand.vmem [shape: bf16[32,64], index: 1, kind: input, shape index: {}]   ;;  %s413_s2 = inlined_call_operand.vmem [shape: f32[1,64], index: 2, kind: input, shape index: {}]   ;;  %s414_s3 = inlined_call_operand.vmem [shape: bf16[64,32], index: 3, kind: input, shape index: {}]   ;;  %s415_s4 = inlined_call_operand.vmem [shape: f32[1,32], index: 4, kind: input, shape index: {}]   ;;  %s416_s5 = inlined_call_operand.hbm [shape: bf16[16,32], index: 5, kind: output, shape index: {}]  }
   0x1   :  { %v293_v0 = vld [vmem:[%s412_s1] sm:$0xff]   ;;  %268 = vmatprep.subr.bf16.mxu0 %v332_v1  ;;  %276 = vmatprep.subr.bf16.mxu1 %v332_v1  ;;  %v294_v2 = vld [vmem:[%s412_s1 + $0x8] sm:$0xff]   ;;  %27 = vst.msk [vmem:[#allocation2] sm:$0xff] %vm26_vm1, %v332_v1  ;;  %28 = vst.msk [vmem:[#allocation2 + $0x8] sm:$0xff] %vm26_vm1, %v332_v1 }
   0x2   :  { %269 = vmatpush3.bf16.msra.mxu0 %v293_v0  ;;  %272 = vmatprep.mubr.msk.bf16.mxu0 %vm333_vm0, %v332_v1  ;;  %v295_v3 = vld [vmem:[%s411_s0] sm:$0xff]  }
   0x3   :  { %270 = vmatprep.subr.bf16.mxu0 %v332_v1  ;;  %284 = vmatprep.mubr.msk.bf16.mxu1 %vm333_vm0, %v332_v1 }
   0x6   :  { %271 = vmatpush3.bf16.msra.mxu0 %v294_v2 }
   0x7   :  { %10 = vsyncpa [#allocation4], 0  ;;  %v296_v4 = vld [vmem:[%s414_s3] sm:$0xff]   ;;  %v297_v5 = vld [vmem:[%s414_s3 + $0x8] sm:$0xff]   ;;  %vm153_vm2 = vcmask 523264   ;;  %s334_s7 = smov [#allocation3]  }
   0x8   :  { %277 = vmatpush3.bf16.msra.mxu1 %v296_v4  ;;  %v298_v6 = vld [vmem:[%s414_s3 + $0x10] sm:$0xff]   ;;  %v299_v7 = vld [vmem:[%s414_s3 + $0x18] sm:$0xff]   ;;  %v243_v8 = vld [vmem:[%s413_s2] ss:$0 sm:$0xff]  ;;  %s232_s8 = sshll.u32 %s334_s7, 4  ;;  %vm224_vm3 = vcmask 257024   ;;  %s233_s8 = int_to_ptr.vmem [resolvable:$true] %s232_s8 }
   0x9   :  { %273 = vmatmul.mubr.msk.bf16.vlgmr.msra.gmra.mrb[0].mxu0 %vm26_vm1, %v295_v3  ;;  %278 = vmatprep.subr.bf16.mxu1 %v332_v1  ;;  %v118_v26 = vld [vmem:[#allocation2] sm:$0xff]  ;;  %v119_v28 = vld [vmem:[#allocation2 + $0x8] sm:$0xff]  ;;  %s308_s9 = scalar_lea.vmem %s233_s8, 128  ;;  %p313_p1 = scmp.lt.s32.totalorder %s233_s8, %s233_s8 }
   0xa   :  { %v255_v34 = vld [vmem:[%s415_s4] ss:$0 sm:$0xff]  ;;  %p309_p0 = scmp.ne.s32.totalorder %s233_s8, %s308_s9  ;;  %p314_p2 = scmp.lt.s32.totalorder %s308_s9, %s308_s9 }
   0xc   :  { %279 = vmatpush3.bf16.msra.mxu1 %v297_v5  ;;  %p315_p3 = por %p314_p2, %p313_p1 }
   0xd   :  { %280 = vmatprep.subr.bf16.mxu1 %v332_v1 }
   0xe   :  { %p316_p4 = pnand %p315_p3, %p309_p0 }
  0x10   :  { %281 = vmatpush3.bf16.msra.mxu1 %v298_v6 }
  0x11   :  { %282 = vmatprep.subr.bf16.mxu1 %v332_v1 }
  0x14   :  { %283 = vmatpush3.bf16.msra.mxu1 %v299_v7 }
  0xdc   :  { %v97_v9 = vpop.f32.mrb[0].mxu0 }
  0xdd   :  { %v98_v10 = vadd.f32 %v243_v8, %v97_v9  ;;  %v274_v11 = vpop.f32.mrb[1].mxu0 }
  0xde   :  { %v100_v12 = vpop.f32.mrb[2].mxu0 }
  0xdf   :  { %v248_v13 = vmul.f32 -1.442695, %v98_v10  ;;  %v101_v14 = vadd.f32 %v243_v8, %v100_v12  ;;  %v275_v15 = vpop.f32.mrb[3].mxu0 }
  0xe1   :  { %300 = vpow2.f32 %v248_v13  ;;  %v249_v16 = vmul.f32 -1.442695, %v101_v14 }
  0xe3   :  { %302 = vpow2.f32 %v249_v16 }
  0xeb   :  { %v301_v17 = vpop.eup %300 }
  0xec   :  { %v110_v18 = vadd.f32 1.0, %v301_v17 }
  0xed   :  { %v303_v19 = vpop.eup %302 }
  0xee   :  { %304 = vrcp.f32 %v110_v18  ;;  %v111_v20 = vadd.f32 1.0, %v303_v19 }
  0xf0   :  { %306 = vrcp.f32 %v111_v20 }
  0xf8   :  { %v305_v21 = vpop.eup %304 }
  0xf9   :  { %v116_v23 = vmul.f32 %v305_v21, %v98_v10 }
  0xfa   :  { %v307_v22 = vpop.eup %306 }
  0xfb   :  { %v117_v24 = vmul.f32 %v307_v22, %v101_v14 }
  0xfd   :  { %v120_v25 = vpack.c.bf16 %v117_v24, %v116_v23 }
  0xff   :  { %285 = vmatmul.mubr.msk.bf16.vlgmr.msra.gmra.mrb[0].mxu1 %vm153_vm2, %v120_v25 }
 0x1d2   :  { %v191_v27 = vpop.f32.mrb[0].mxu1 }
 0x1d3   :  { %v198_v29 = vadd.f32 %v191_v27, %v118_v26  ;;  %v286_v30 = vpop.f32.mrb[1].mxu1 }
 0x1d4   :  { %v194_v31 = vpop.f32.mrb[2].mxu1 }
 0x1d5   :  { %200 = vst.msk [vmem:[#allocation2] sm:$0xff] %vm26_vm1, %v198_v29  ;;  %v199_v32 = vadd.f32 %v194_v31, %v119_v28  ;;  %v287_v33 = vpop.f32.mrb[3].mxu1 }
 0x1d7   :  { %201 = vst.msk [vmem:[#allocation2 + $0x8] sm:$0xff] %vm26_vm1, %v199_v32 }
 0x1dc   :  { %v205_v35 = vld [vmem:[#allocation2] sm:$0xff] }
 0x1dd   :  { %v214_v36 = vadd.f32 %v255_v34, %v205_v35 }
 0x1de   :  { %v206_v37 = vld [vmem:[#allocation2 + $0x8] sm:$0xff] }
 0x1df   :  { %v215_v38 = vadd.f32 %v255_v34, %v206_v37  ;;  %v258_v39 = vpack.c.bf16 %v214_v36, %v214_v36 }
 0x1e1   :  { %v259_v40 = vpack.c.bf16 %v215_v38, %v215_v38  ;;  %225 = vst.msk [vmem:[#allocation3] sm:$0xf] %vm224_vm3, %v258_v39 }
 0x1e3   :  { %226 = vst.msk [vmem:[#allocation3 + $0x4] sm:$0xf] %vm224_vm3, %v259_v40 }
 0x1e4   :  { %319 = shalt.err (!%p316_p4)
}
 0x1e5   :  { %s320_s11 = scalar_lea.hbm %s416_s5, 128 }
 0x1e6   :  { %p321_p5 = scmp.ne.s32.totalorder %s416_s5, %s320_s11  ;;  %p324_p6 = scmp.lt.u32.totalorder %s320_s11, %s416_s5 }
 0x1e8   :  { %p326_p7 = pnand %p324_p6, %p321_p5 }
 0x1ea   :  { %329 = shalt.err (!%p326_p7)
}
 0x1eb   :  { %s335_s16 = smov 64   ;;  %s336_s17 = smov 4  }
 0x1ec   :  { %238 = dma.vmem_to_hbm [thread:$0]  %s233_s8, 128, %s416_s5, [#allocation4], %s335_s16, %s335_s16, %s336_s17  }
 0x1ed   :  { %330 = dma.done.wait [#allocation4], 128  }
 0x1ee   :  { %331 = vsyncadd [#allocation4], 4294967168 }
 0x1ef   :  { %242 = vsyncpa [#allocation4], 1 }

</bundles_post_ra>
